<compile_context>
chip_gen: v7x
topology: tpu7x:2x2x1
jax: 0.10.0
libtpu: 0.0.40
codegen_flags: <defaults>
</compile_context>

<pallas_src>
import functools

import jax
import jax.numpy as jnp
import numpy as np
from jax.experimental import pallas as pl
from jax.experimental.pallas import tpu as pltpu


def gru_kernel(gx_ref, whh_ref, bhh_ref, wlh_ref, wg_ref, bl_ref, g_ref,
               out_ref, h_scr, acc_scr, *, block_t, hidden):
    """One grid step == `block_t` timesteps of the GRU recurrence + fused Linear."""
    blk = pl.program_id(0)
    H = hidden

    @pl.when(blk == 0)
    def _():
        h_scr[...] = jnp.zeros_like(h_scr)      # h_0 = 0 (PyTorch default)
        acc_scr[...] = jnp.zeros_like(acc_scr)  # fused Linear accumulator

    # Grid-invariant operands (loaded once per block, outside the unrolled loop).
    whh = whh_ref[...]       # (H, 3H) f32 : fused W_hh^T
    bhh = bhh_ref[...]       # (1, 3H) f32

    def step(i, carry):
        h, acc = carry                                        # (B,H) f32, (B,C) f32
        gx = gx_ref[i]                                        # (B, 3H): x@W_ih^T + b_ih
        gh = jnp.dot(h, whh, preferred_element_type=jnp.float32) + bhh   # (B, 3H)
        # gate order [r | z | n] along the 3H axis
        rz = jax.nn.sigmoid(gx[:, :2 * H] + gh[:, :2 * H])
        r = rz[:, :H]
        z = rz[:, H:]
        n = jnp.tanh(gx[:, 2 * H:] + r * gh[:, 2 * H:])
        h_new = (1.0 - z) * n + z * h                         # (B, H) f32
        # fused Linear head: this frame's slab of the big Linear weight (bf16),
        # accumulated in f32.
        acc = acc + jnp.dot(h_new.astype(wlh_ref.dtype), wlh_ref[i],
                            preferred_element_type=jnp.float32)
        return h_new, acc

    h, acc = jax.lax.fori_loop(0, block_t, step, (h_scr[...], acc_scr[...]),
                               unroll=True)
    h_scr[...] = h
    acc_scr[...] = acc

    @pl.when(blk == pl.num_programs(0) - 1)
    def _():
        out_ref[...] = (acc
                        + jnp.dot(g_ref[...], wg_ref[...],
                                  preferred_element_type=jnp.float32)
                        + bl_ref[...])


def gru_forward(local_f, global_f, params, num_classes, block_t=4):
    """Wrapper: hoisted input projection + parameter re-layout + pallas_call."""
    weight_ih, weight_hh, bias_ih, bias_hh, lin_w, lin_b = params
    B, T, I = local_f.shape
    H = weight_hh.shape[1]
    G = global_f.shape[1]
    C = num_classes

    # ---- hoisted input projection: one big matmul instead of T tiny ones ----
    x_tm = jnp.transpose(local_f, (1, 0, 2)).astype(jnp.float32)          # (T, B, I)
    gates_x = (jnp.einsum('tbi,ih->tbh', x_tm, weight_ih.T,
                          precision=jax.lax.Precision.HIGHEST)
               + bias_ih.reshape(1, 1, 3 * H)).astype(jnp.float32)        # (T, B, 3H)

    # ---- fused hidden weights ----
    whh_k = jnp.transpose(weight_hh, (1, 0)).astype(jnp.float32)          # (H, 3H)
    bhh_k = bias_hh.reshape(1, 3 * H).astype(jnp.float32)

    # ---- Linear weight (C, T*H + G): per-frame slabs (bf16) + global slab ----
    wlh_k = jnp.transpose(lin_w[:, :T * H].reshape(C, T, H), (1, 2, 0))   # (T, H, C)
    wg_k = jnp.transpose(lin_w[:, T * H:], (1, 0)).astype(jnp.float32)    # (G, C)
    bl_k = lin_b.reshape(1, C).astype(jnp.float32)

    # ---- pad T to a multiple of block_t (zero gates + zero slab => no effect) ----
    n_blk = (T + block_t - 1) // block_t
    T_pad = n_blk * block_t
    if T_pad != T:
        gates_x = jnp.pad(gates_x, ((0, T_pad - T), (0, 0), (0, 0)))
        wlh_k = jnp.pad(wlh_k, ((0, T_pad - T), (0, 0), (0, 0)))
    wlh_k = wlh_k.astype(jnp.bfloat16)   # dominant HBM stream -> bf16 MXU operand

    kernel = functools.partial(gru_kernel, block_t=block_t, hidden=H)

    out = pl.pallas_call(
        kernel,
        out_shape=jax.ShapeDtypeStruct((B, C), jnp.float32),
        grid_spec=pltpu.PrefetchScalarGridSpec(
            num_scalar_prefetch=0,
            grid=(n_blk,),
            in_specs=[
                pl.BlockSpec((block_t, B, 3 * H), lambda t: (t, 0, 0)),  # gates_x blk
                pl.BlockSpec((H, 3 * H), lambda t: (0, 0)),              # W_hh^T fused
                pl.BlockSpec((1, 3 * H), lambda t: (0, 0)),              # b_hh
                pl.BlockSpec((block_t, H, C), lambda t: (t, 0, 0)),      # Linear slab
                pl.BlockSpec((G, C), lambda t: (0, 0)),                  # global weight
                pl.BlockSpec((1, C), lambda t: (0, 0)),                  # Linear bias
                pl.BlockSpec((B, G), lambda t: (0, 0)),                  # global feats
            ],
            out_specs=pl.BlockSpec((B, C), lambda t: (0, 0)),
            scratch_shapes=[
                pltpu.VMEM((B, H), jnp.float32),   # hidden-state carry (f32)
                pltpu.VMEM((B, C), jnp.float32),   # Linear accumulator (f32)
            ],
        ),
        compiler_params=pltpu.CompilerParams(
            dimension_semantics=("arbitrary",)),   # recurrence -> strictly serial
    )(gates_x, whh_k, bhh_k, wlh_k, wg_k, bl_k, global_f.astype(jnp.float32))
    return out


def gru_reference(local_f, global_f, params):
    """Pure-JAX f32 reference with PyTorch GRU semantics (correctness check)."""
    weight_ih, weight_hh, bias_ih, bias_hh, lin_w, lin_b = params
    B, T, I = local_f.shape
    H = weight_hh.shape[1]

    def step(h, x_t):
        gi = x_t @ weight_ih.T + bias_ih
        gh = h @ weight_hh.T + bias_hh
        i_r, i_z, i_n = jnp.split(gi, 3, axis=-1)
        h_r, h_z, h_n = jnp.split(gh, 3, axis=-1)
        r = jax.nn.sigmoid(i_r + h_r)
        z = jax.nn.sigmoid(i_z + h_z)
        n = jnp.tanh(i_n + r * h_n)
        h_new = (1.0 - z) * n + z * h
        return h_new, h_new

    h0 = jnp.zeros((B, H), jnp.float32)
    _, hs = jax.lax.scan(step, h0, jnp.transpose(local_f, (1, 0, 2)))
    hs = jnp.transpose(hs, (1, 0, 2))                           # (B, T, H)
    lin_in = jnp.concatenate([hs.reshape(B, -1), global_f], axis=-1)
    return lin_in @ lin_w.T + lin_b


if __name__ == "__main__":
    # Small, module-consistent shapes (full model: T=750, I=188, H=512, C=56, G=1).
    B, T, I, H, C, G = 2, 8, 16, 32, 8, 1

    key = jax.random.PRNGKey(0)
    ks = jax.random.split(key, 8)
    kh = 1.0 / np.sqrt(H)
    kl = 1.0 / np.sqrt(H * T + G)

    weight_ih = jax.random.uniform(ks[0], (3 * H, I), jnp.float32, -kh, kh)
    weight_hh = jax.random.uniform(ks[1], (3 * H, H), jnp.float32, -kh, kh)
    bias_ih = jax.random.uniform(ks[2], (3 * H,), jnp.float32, -kh, kh)
    bias_hh = jax.random.uniform(ks[3], (3 * H,), jnp.float32, -kh, kh)
    lin_w = jax.random.uniform(ks[4], (C, H * T + G), jnp.float32, -kl, kl)
    lin_b = jax.random.uniform(ks[5], (C,), jnp.float32, -kl, kl)
    params = (weight_ih, weight_hh, bias_ih, bias_hh, lin_w, lin_b)

    local_f = jax.random.normal(ks[6], (B, T, I), jnp.float32)
    global_f = jax.random.normal(ks[7], (B, G), jnp.float32)

    ref = jax.block_until_ready(gru_reference(local_f, global_f, params))

    # Case 1: block_t divides T (main path).
    fwd = jax.jit(functools.partial(gru_forward, num_classes=C, block_t=4))
    out = jax.block_until_ready(fwd(local_f, global_f, params))
    # bf16 Linear-weight operand => slightly looser tolerance than pure f32.
    np.testing.assert_allclose(np.asarray(out), np.asarray(ref),
                               rtol=1e-2, atol=1e-2)

    # Case 2: block_t does NOT divide T (exercises the zero-padding path).
    fwd2 = jax.jit(functools.partial(gru_forward, num_classes=C, block_t=3))
    out2 = jax.block_until_ready(fwd2(local_f, global_f, params))
    np.testing.assert_allclose(np.asarray(out2), np.asarray(ref),
                               rtol=1e-2, atol=1e-2)

    print("KERNEL_OK")
</pallas_src>

<mosaic_0001>
module attributes {stable_mosaic.version = 11 : i64} {
  func.func @gru_kernel(%arg0: i32, %arg1: memref<4x2x96xf32, #tpu.memory_space<vmem>>, %arg2: memref<32x96xf32, #tpu.memory_space<vmem>>, %arg3: memref<1x96xf32, #tpu.memory_space<vmem>>, %arg4: memref<4x32x8xbf16, #tpu.memory_space<vmem>>, %arg5: memref<1x8xf32, #tpu.memory_space<vmem>>, %arg6: memref<1x8xf32, #tpu.memory_space<vmem>>, %arg7: memref<2x1xf32, #tpu.memory_space<vmem>>, %arg8: memref<2x8xf32, #tpu.memory_space<vmem>>, %arg9: memref<2x32xf32, #tpu.memory_space<vmem>>, %arg10: memref<2x8xf32, #tpu.memory_space<vmem>>) attributes {dimension_semantics = [#tpu.dimension_semantics<arbitrary>], iteration_bounds = array<i64: 2>, scalar_prefetch = 0 : i64, scratch_operands = 2 : i64, tpu.core_type = #tpu.core_type<tc>, window_params = [{transform_indices = @transform_0, window_bounds = array<i64: 4, 2, 96>}, {pipeline_mode = #tpu.pipeline_mode<synchronous>, transform_indices = @transform_1, window_bounds = array<i64: 32, 96>}, {pipeline_mode = #tpu.pipeline_mode<synchronous>, transform_indices = @transform_2, window_bounds = array<i64: 1, 96>}, {transform_indices = @transform_3, window_bounds = array<i64: 4, 32, 8>}, {pipeline_mode = #tpu.pipeline_mode<synchronous>, transform_indices = @transform_4, window_bounds = array<i64: 1, 8>}, {pipeline_mode = #tpu.pipeline_mode<synchronous>, transform_indices = @transform_5, window_bounds = array<i64: 1, 8>}, {pipeline_mode = #tpu.pipeline_mode<synchronous>, transform_indices = @transform_6, window_bounds = array<i64: 2, 1>}, {pipeline_mode = #tpu.pipeline_mode<synchronous>, transform_indices = @transform_7, window_bounds = array<i64: 2, 8>}]} {
    %c0_i32 = arith.constant 0 : i32
    %0 = arith.cmpi eq, %arg0, %c0_i32 : i32
    %1 = arith.extui %0 : i1 to i32
    %c0_i32_0 = arith.constant 0 : i32
    %2 = arith.cmpi ne, %1, %c0_i32_0 : i32
    scf.if %2 {
      %cst_46 = arith.constant 0.000000e+00 : f32
      %140 = vector.broadcast %cst_46 : f32 to vector<2x32xf32>
      %c0_47 = arith.constant 0 : index
      %c0_48 = arith.constant 0 : index
      %141 = vector.load %arg9[%c0_47, %c0_48] : memref<2x32xf32, #tpu.memory_space<vmem>>, vector<2x32xf32>
      tpu.vector_store %arg9[%c0_47, %c0_48], %140 {strides = array<i32>} : memref<2x32xf32, #tpu.memory_space<vmem>>, vector<2x32xf32>,
      %cst_49 = arith.constant 0.000000e+00 : f32
      %142 = vector.broadcast %cst_49 : f32 to vector<2x8xf32>
      %c0_50 = arith.constant 0 : index
      %c0_51 = arith.constant 0 : index
      %143 = vector.load %arg10[%c0_50, %c0_51] : memref<2x8xf32, #tpu.memory_space<vmem>>, vector<2x8xf32>
      tpu.vector_store %arg10[%c0_50, %c0_51], %142 {strides = array<i32>} : memref<2x8xf32, #tpu.memory_space<vmem>>, vector<2x8xf32>,
    } else {
    }
    %c0 = arith.constant 0 : index
    %c0_1 = arith.constant 0 : index
    %3 = vector.load %arg2[%c0, %c0_1] : memref<32x96xf32, #tpu.memory_space<vmem>>, vector<32x96xf32>
    %c0_2 = arith.constant 0 : index
    %c0_3 = arith.constant 0 : index
    %4 = vector.load %arg3[%c0_2, %c0_3] : memref<1x96xf32, #tpu.memory_space<vmem>>, vector<1x96xf32>
    %c0_4 = arith.constant 0 : index
    %c0_5 = arith.constant 0 : index
    %5 = vector.load %arg9[%c0_4, %c0_5] : memref<2x32xf32, #tpu.memory_space<vmem>>, vector<2x32xf32>
    %c0_6 = arith.constant 0 : index
    %c0_7 = arith.constant 0 : index
    %6 = vector.load %arg10[%c0_6, %c0_7] : memref<2x8xf32, #tpu.memory_space<vmem>>, vector<2x8xf32>
    %c0_i32_8 = arith.constant 0 : i32
    %7 = arith.index_cast %c0_i32_8 : i32 to index
    %c0_9 = arith.constant 0 : index
    %c0_10 = arith.constant 0 : index
    %8 = vector.load %arg1[%7, %c0_9, %c0_10] : memref<4x2x96xf32, #tpu.memory_space<vmem>>, vector<1x2x96xf32>
    %9 = vector.shape_cast %8 : vector<1x2x96xf32> to vector<2x96xf32>
    %cst = arith.constant dense<0.000000e+00> : vector<2x96xf32>
    %10 = tpu.matmul %5, %3, %cst {dimension_numbers = #tpu.dot_dimension_numbers<[1], [0], [0], [1], [0, 0, 1, 1], [], []>} : vector<2x32xf32>, vector<32x96xf32>, vector<2x96xf32> -> vector<2x96xf32>
    %11 = vector.broadcast %4 : vector<1x96xf32> to vector<2x96xf32>
    %12 = arith.addf %10, %11 : vector<2x96xf32>
    %13 = vector.extract_strided_slice %9 {offsets = [0, 0], sizes = [2, 64], strides = [1, 1]} : vector<2x96xf32> to vector<2x64xf32>
    %14 = vector.extract_strided_slice %12 {offsets = [0, 0], sizes = [2, 64], strides = [1, 1]} : vector<2x96xf32> to vector<2x64xf32>
    %15 = arith.addf %13, %14 : vector<2x64xf32>
    %16 = arith.negf %15 : vector<2x64xf32>
    %17 = math.exp %16 : vector<2x64xf32>
    %cst_11 = arith.constant 1.000000e+00 : f32
    %18 = vector.broadcast %cst_11 : f32 to vector<2x64xf32>
    %19 = arith.addf %18, %17 : vector<2x64xf32>
    %20 = arith.divf %18, %19 : vector<2x64xf32>
    %21 = vector.extract_strided_slice %20 {offsets = [0, 0], sizes = [2, 32], strides = [1, 1]} : vector<2x64xf32> to vector<2x32xf32>
    %22 = vector.extract_strided_slice %20 {offsets = [0, 32], sizes = [2, 32], strides = [1, 1]} : vector<2x64xf32> to vector<2x32xf32>
    %23 = vector.extract_strided_slice %9 {offsets = [0, 64], sizes = [2, 32], strides = [1, 1]} : vector<2x96xf32> to vector<2x32xf32>
    %24 = vector.extract_strided_slice %12 {offsets = [0, 64], sizes = [2, 32], strides = [1, 1]} : vector<2x96xf32> to vector<2x32xf32>
    %25 = arith.mulf %21, %24 : vector<2x32xf32>
    %26 = arith.addf %23, %25 : vector<2x32xf32>
    %27 = math.tanh %26 : vector<2x32xf32>
    %cst_12 = arith.constant 1.000000e+00 : f32
    %28 = vector.broadcast %cst_12 : f32 to vector<2x32xf32>
    %29 = arith.subf %28, %22 : vector<2x32xf32>
    %30 = arith.mulf %29, %27 : vector<2x32xf32>
    %31 = arith.mulf %22, %5 : vector<2x32xf32>
    %32 = arith.addf %30, %31 : vector<2x32xf32>
    %33 = arith.truncf %32 : vector<2x32xf32> to vector<2x32xbf16>
    %34 = arith.index_cast %c0_i32_8 : i32 to index
    %c0_13 = arith.constant 0 : index
    %c0_14 = arith.constant 0 : index
    %35 = vector.load %arg4[%34, %c0_13, %c0_14] : memref<4x32x8xbf16, #tpu.memory_space<vmem>>, vector<1x32x8xbf16>
    %36 = vector.shape_cast %35 : vector<1x32x8xbf16> to vector<32x8xbf16>
    %cst_15 = arith.constant dense<0.000000e+00> : vector<2x8xf32>
    %37 = tpu.matmul %33, %36, %cst_15 {dimension_numbers = #tpu.dot_dimension_numbers<[1], [0], [0], [1], [0, 0, 1, 1], [], []>} : vector<2x32xbf16>, vector<32x8xbf16>, vector<2x8xf32> -> vector<2x8xf32>
    %38 = arith.addf %6, %37 : vector<2x8xf32>
    %c1_i32 = arith.constant 1 : i32
    %39 = arith.index_cast %c1_i32 : i32 to index
    %c0_16 = arith.constant 0 : index
    %c0_17 = arith.constant 0 : index
    %40 = vector.load %arg1[%39, %c0_16, %c0_17] : memref<4x2x96xf32, #tpu.memory_space<vmem>>, vector<1x2x96xf32>
    %41 = vector.shape_cast %40 : vector<1x2x96xf32> to vector<2x96xf32>
    %cst_18 = arith.constant dense<0.000000e+00> : vector<2x96xf32>
    %42 = tpu.matmul %32, %3, %cst_18 {dimension_numbers = #tpu.dot_dimension_numbers<[1], [0], [0], [1], [0, 0, 1, 1], [], []>} : vector<2x32xf32>, vector<32x96xf32>, vector<2x96xf32> -> vector<2x96xf32>
    %43 = vector.broadcast %4 : vector<1x96xf32> to vector<2x96xf32>
    %44 = arith.addf %42, %43 : vector<2x96xf32>
    %45 = vector.extract_strided_slice %41 {offsets = [0, 0], sizes = [2, 64], strides = [1, 1]} : vector<2x96xf32> to vector<2x64xf32>
    %46 = vector.extract_strided_slice %44 {offsets = [0, 0], sizes = [2, 64], strides = [1, 1]} : vector<2x96xf32> to vector<2x64xf32>
    %47 = arith.addf %45, %46 : vector<2x64xf32>
    %48 = arith.negf %47 : vector<2x64xf32>
    %49 = math.exp %48 : vector<2x64xf32>
    %cst_19 = arith.constant 1.000000e+00 : f32
    %50 = vector.broadcast %cst_19 : f32 to vector<2x64xf32>
    %51 = arith.addf %50, %49 : vector<2x64xf32>
    %52 = arith.divf %50, %51 : vector<2x64xf32>
    %53 = vector.extract_strided_slice %52 {offsets = [0, 0], sizes = [2, 32], strides = [1, 1]} : vector<2x64xf32> to vector<2x32xf32>
    %54 = vector.extract_strided_slice %52 {offsets = [0, 32], sizes = [2, 32], strides = [1, 1]} : vector<2x64xf32> to vector<2x32xf32>
    %55 = vector.extract_strided_slice %41 {offsets = [0, 64], sizes = [2, 32], strides = [1, 1]} : vector<2x96xf32> to vector<2x32xf32>
    %56 = vector.extract_strided_slice %44 {offsets = [0, 64], sizes = [2, 32], strides = [1, 1]} : vector<2x96xf32> to vector<2x32xf32>
    %57 = arith.mulf %53, %56 : vector<2x32xf32>
    %58 = arith.addf %55, %57 : vector<2x32xf32>
    %59 = math.tanh %58 : vector<2x32xf32>
    %cst_20 = arith.constant 1.000000e+00 : f32
    %60 = vector.broadcast %cst_20 : f32 to vector<2x32xf32>
    %61 = arith.subf %60, %54 : vector<2x32xf32>
    %62 = arith.mulf %61, %59 : vector<2x32xf32>
    %63 = arith.mulf %54, %32 : vector<2x32xf32>
    %64 = arith.addf %62, %63 : vector<2x32xf32>
    %65 = arith.truncf %64 : vector<2x32xf32> to vector<2x32xbf16>
    %66 = arith.index_cast %c1_i32 : i32 to index
    %c0_21 = arith.constant 0 : index
    %c0_22 = arith.constant 0 : index
    %67 = vector.load %arg4[%66, %c0_21, %c0_22] : memref<4x32x8xbf16, #tpu.memory_space<vmem>>, vector<1x32x8xbf16>
    %68 = vector.shape_cast %67 : vector<1x32x8xbf16> to vector<32x8xbf16>
    %cst_23 = arith.constant dense<0.000000e+00> : vector<2x8xf32>
    %69 = tpu.matmul %65, %68, %cst_23 {dimension_numbers = #tpu.dot_dimension_numbers<[1], [0], [0], [1], [0, 0, 1, 1], [], []>} : vector<2x32xbf16>, vector<32x8xbf16>, vector<2x8xf32> -> vector<2x8xf32>
    %70 = arith.addf %38, %69 : vector<2x8xf32>
    %c2_i32 = arith.constant 2 : i32
    %71 = arith.index_cast %c2_i32 : i32 to index
    %c0_24 = arith.constant 0 : index
    %c0_25 = arith.constant 0 : index
    %72 = vector.load %arg1[%71, %c0_24, %c0_25] : memref<4x2x96xf32, #tpu.memory_space<vmem>>, vector<1x2x96xf32>
    %73 = vector.shape_cast %72 : vector<1x2x96xf32> to vector<2x96xf32>
    %cst_26 = arith.constant dense<0.000000e+00> : vector<2x96xf32>
    %74 = tpu.matmul %64, %3, %cst_26 {dimension_numbers = #tpu.dot_dimension_numbers<[1], [0], [0], [1], [0, 0, 1, 1], [], []>} : vector<2x32xf32>, vector<32x96xf32>, vector<2x96xf32> -> vector<2x96xf32>
    %75 = vector.broadcast %4 : vector<1x96xf32> to vector<2x96xf32>
    %76 = arith.addf %74, %75 : vector<2x96xf32>
    %77 = vector.extract_strided_slice %73 {offsets = [0, 0], sizes = [2, 64], strides = [1, 1]} : vector<2x96xf32> to vector<2x64xf32>
    %78 = vector.extract_strided_slice %76 {offsets = [0, 0], sizes = [2, 64], strides = [1, 1]} : vector<2x96xf32> to vector<2x64xf32>
    %79 = arith.addf %77, %78 : vector<2x64xf32>
    %80 = arith.negf %79 : vector<2x64xf32>
    %81 = math.exp %80 : vector<2x64xf32>
    %cst_27 = arith.constant 1.000000e+00 : f32
    %82 = vector.broadcast %cst_27 : f32 to vector<2x64xf32>
    %83 = arith.addf %82, %81 : vector<2x64xf32>
    %84 = arith.divf %82, %83 : vector<2x64xf32>
    %85 = vector.extract_strided_slice %84 {offsets = [0, 0], sizes = [2, 32], strides = [1, 1]} : vector<2x64xf32> to vector<2x32xf32>
    %86 = vector.extract_strided_slice %84 {offsets = [0, 32], sizes = [2, 32], strides = [1, 1]} : vector<2x64xf32> to vector<2x32xf32>
    %87 = vector.extract_strided_slice %73 {offsets = [0, 64], sizes = [2, 32], strides = [1, 1]} : vector<2x96xf32> to vector<2x32xf32>
    %88 = vector.extract_strided_slice %76 {offsets = [0, 64], sizes = [2, 32], strides = [1, 1]} : vector<2x96xf32> to vector<2x32xf32>
    %89 = arith.mulf %85, %88 : vector<2x32xf32>
    %90 = arith.addf %87, %89 : vector<2x32xf32>
    %91 = math.tanh %90 : vector<2x32xf32>
    %cst_28 = arith.constant 1.000000e+00 : f32
    %92 = vector.broadcast %cst_28 : f32 to vector<2x32xf32>
    %93 = arith.subf %92, %86 : vector<2x32xf32>
    %94 = arith.mulf %93, %91 : vector<2x32xf32>
    %95 = arith.mulf %86, %64 : vector<2x32xf32>
    %96 = arith.addf %94, %95 : vector<2x32xf32>
    %97 = arith.truncf %96 : vector<2x32xf32> to vector<2x32xbf16>
    %98 = arith.index_cast %c2_i32 : i32 to index
    %c0_29 = arith.constant 0 : index
    %c0_30 = arith.constant 0 : index
    %99 = vector.load %arg4[%98, %c0_29, %c0_30] : memref<4x32x8xbf16, #tpu.memory_space<vmem>>, vector<1x32x8xbf16>
    %100 = vector.shape_cast %99 : vector<1x32x8xbf16> to vector<32x8xbf16>
    %cst_31 = arith.constant dense<0.000000e+00> : vector<2x8xf32>
    %101 = tpu.matmul %97, %100, %cst_31 {dimension_numbers = #tpu.dot_dimension_numbers<[1], [0], [0], [1], [0, 0, 1, 1], [], []>} : vector<2x32xbf16>, vector<32x8xbf16>, vector<2x8xf32> -> vector<2x8xf32>
    %102 = arith.addf %70, %101 : vector<2x8xf32>
    %c3_i32 = arith.constant 3 : i32
    %103 = arith.index_cast %c3_i32 : i32 to index
    %c0_32 = arith.constant 0 : index
    %c0_33 = arith.constant 0 : index
    %104 = vector.load %arg1[%103, %c0_32, %c0_33] : memref<4x2x96xf32, #tpu.memory_space<vmem>>, vector<1x2x96xf32>
    %105 = vector.shape_cast %104 : vector<1x2x96xf32> to vector<2x96xf32>
    %cst_34 = arith.constant dense<0.000000e+00> : vector<2x96xf32>
    %106 = tpu.matmul %96, %3, %cst_34 {dimension_numbers = #tpu.dot_dimension_numbers<[1], [0], [0], [1], [0, 0, 1, 1], [], []>} : vector<2x32xf32>, vector<32x96xf32>, vector<2x96xf32> -> vector<2x96xf32>
    %107 = vector.broadcast %4 : vector<1x96xf32> to vector<2x96xf32>
    %108 = arith.addf %106, %107 : vector<2x96xf32>
    %109 = vector.extract_strided_slice %105 {offsets = [0, 0], sizes = [2, 64], strides = [1, 1]} : vector<2x96xf32> to vector<2x64xf32>
    %110 = vector.extract_strided_slice %108 {offsets = [0, 0], sizes = [2, 64], strides = [1, 1]} : vector<2x96xf32> to vector<2x64xf32>
    %111 = arith.addf %109, %110 : vector<2x64xf32>
    %112 = arith.negf %111 : vector<2x64xf32>
    %113 = math.exp %112 : vector<2x64xf32>
    %cst_35 = arith.constant 1.000000e+00 : f32
    %114 = vector.broadcast %cst_35 : f32 to vector<2x64xf32>
    %115 = arith.addf %114, %113 : vector<2x64xf32>
    %116 = arith.divf %114, %115 : vector<2x64xf32>
    %117 = vector.extract_strided_slice %116 {offsets = [0, 0], sizes = [2, 32], strides = [1, 1]} : vector<2x64xf32> to vector<2x32xf32>
    %118 = vector.extract_strided_slice %116 {offsets = [0, 32], sizes = [2, 32], strides = [1, 1]} : vector<2x64xf32> to vector<2x32xf32>
    %119 = vector.extract_strided_slice %105 {offsets = [0, 64], sizes = [2, 32], strides = [1, 1]} : vector<2x96xf32> to vector<2x32xf32>
    %120 = vector.extract_strided_slice %108 {offsets = [0, 64], sizes = [2, 32], strides = [1, 1]} : vector<2x96xf32> to vector<2x32xf32>
    %121 = arith.mulf %117, %120 : vector<2x32xf32>
    %122 = arith.addf %119, %121 : vector<2x32xf32>
    %123 = math.tanh %122 : vector<2x32xf32>
    %cst_36 = arith.constant 1.000000e+00 : f32
    %124 = vector.broadcast %cst_36 : f32 to vector<2x32xf32>
    %125 = arith.subf %124, %118 : vector<2x32xf32>
    %126 = arith.mulf %125, %123 : vector<2x32xf32>
    %127 = arith.mulf %118, %96 : vector<2x32xf32>
    %128 = arith.addf %126, %127 : vector<2x32xf32>
    %129 = arith.truncf %128 : vector<2x32xf32> to vector<2x32xbf16>
    %130 = arith.index_cast %c3_i32 : i32 to index
    %c0_37 = arith.constant 0 : index
    %c0_38 = arith.constant 0 : index
    %131 = vector.load %arg4[%130, %c0_37, %c0_38] : memref<4x32x8xbf16, #tpu.memory_space<vmem>>, vector<1x32x8xbf16>
    %132 = vector.shape_cast %131 : vector<1x32x8xbf16> to vector<32x8xbf16>
    %cst_39 = arith.constant dense<0.000000e+00> : vector<2x8xf32>
    %133 = tpu.matmul %129, %132, %cst_39 {dimension_numbers = #tpu.dot_dimension_numbers<[1], [0], [0], [1], [0, 0, 1, 1], [], []>} : vector<2x32xbf16>, vector<32x8xbf16>, vector<2x8xf32> -> vector<2x8xf32>
    %134 = arith.addf %102, %133 : vector<2x8xf32>
    %c4_i32 = arith.constant 4 : i32
    %c0_40 = arith.constant 0 : index
    %c0_41 = arith.constant 0 : index
    %135 = vector.load %arg9[%c0_40, %c0_41] : memref<2x32xf32, #tpu.memory_space<vmem>>, vector<2x32xf32>
    tpu.vector_store %arg9[%c0_40, %c0_41], %128 {strides = array<i32>} : memref<2x32xf32, #tpu.memory_space<vmem>>, vector<2x32xf32>,
    %c0_42 = arith.constant 0 : index
    %c0_43 = arith.constant 0 : index
    %136 = vector.load %arg10[%c0_42, %c0_43] : memref<2x8xf32, #tpu.memory_space<vmem>>, vector<2x8xf32>
    tpu.vector_store %arg10[%c0_42, %c0_43], %134 {strides = array<i32>} : memref<2x8xf32, #tpu.memory_space<vmem>>, vector<2x8xf32>,
    %c1_i32_44 = arith.constant 1 : i32
    %137 = arith.cmpi eq, %arg0, %c1_i32_44 : i32
    %138 = arith.extui %137 : i1 to i32
    %c0_i32_45 = arith.constant 0 : i32
    %139 = arith.cmpi ne, %138, %c0_i32_45 : i32
    scf.if %139 {
      %c0_46 = arith.constant 0 : index
      %c0_47 = arith.constant 0 : index
      %140 = vector.load %arg7[%c0_46, %c0_47] : memref<2x1xf32, #tpu.memory_space<vmem>>, vector<2x1xf32>
      %c0_48 = arith.constant 0 : index
      %c0_49 = arith.constant 0 : index
      %141 = vector.load %arg5[%c0_48, %c0_49] : memref<1x8xf32, #tpu.memory_space<vmem>>, vector<1x8xf32>
      %cst_50 = arith.constant dense<0.000000e+00> : vector<2x8xf32>
      %142 = tpu.matmul %140, %141, %cst_50 {dimension_numbers = #tpu.dot_dimension_numbers<[1], [0], [0], [1], [0, 0, 1, 1], [], []>} : vector<2x1xf32>, vector<1x8xf32>, vector<2x8xf32> -> vector<2x8xf32>
      %143 = arith.addf %134, %142 : vector<2x8xf32>
      %c0_51 = arith.constant 0 : index
      %c0_52 = arith.constant 0 : index
      %144 = vector.load %arg6[%c0_51, %c0_52] : memref<1x8xf32, #tpu.memory_space<vmem>>, vector<1x8xf32>
      %145 = vector.broadcast %144 : vector<1x8xf32> to vector<2x8xf32>
      %146 = arith.addf %143, %145 : vector<2x8xf32>
      %c0_53 = arith.constant 0 : index
      %c0_54 = arith.constant 0 : index
      %147 = vector.load %arg8[%c0_53, %c0_54] : memref<2x8xf32, #tpu.memory_space<vmem>>, vector<2x8xf32>
      tpu.vector_store %arg8[%c0_53, %c0_54], %146 {strides = array<i32>} : memref<2x8xf32, #tpu.memory_space<vmem>>, vector<2x8xf32>,
    } else {
    }
    return
  }
  func.func @transform_0(%arg0: i32) -> (i32, i32, i32) {
    %c0_i32 = arith.constant 0 : i32
    %c0_i32_0 = arith.constant 0 : i32
    %c0_i32_1 = arith.constant 0 : i32
    return %arg0, %c0_i32, %c0_i32_0 : i32, i32, i32
  }
  func.func @transform_1(%arg0: i32) -> (i32, i32) {
    %c0_i32 = arith.constant 0 : i32
    %c0_i32_0 = arith.constant 0 : i32
    %c0_i32_1 = arith.constant 0 : i32
    return %c0_i32, %c0_i32_0 : i32, i32
  }
  func.func @transform_2(%arg0: i32) -> (i32, i32) {
    %c0_i32 = arith.constant 0 : i32
    %c0_i32_0 = arith.constant 0 : i32
    %c0_i32_1 = arith.constant 0 : i32
    return %c0_i32, %c0_i32_0 : i32, i32
  }
  func.func @transform_3(%arg0: i32) -> (i32, i32, i32) {
    %c0_i32 = arith.constant 0 : i32
    %c0_i32_0 = arith.constant 0 : i32
    %c0_i32_1 = arith.constant 0 : i32
    return %arg0, %c0_i32, %c0_i32_0 : i32, i32, i32
  }
  func.func @transform_4(%arg0: i32) -> (i32, i32) {
    %c0_i32 = arith.constant 0 : i32
    %c0_i32_0 = arith.constant 0 : i32
    %c0_i32_1 = arith.constant 0 : i32
    return %c0_i32, %c0_i32_0 : i32, i32
  }
  func.func @transform_5(%arg0: i32) -> (i32, i32) {
    %c0_i32 = arith.constant 0 : i32
    %c0_i32_0 = arith.constant 0 : i32
    %c0_i32_1 = arith.constant 0 : i32
    return %c0_i32, %c0_i32_0 : i32, i32
  }
  func.func @transform_6(%arg0: i32) -> (i32, i32) {
    %c0_i32 = arith.constant 0 : i32
    %c0_i32_0 = arith.constant 0 : i32
    %c0_i32_1 = arith.constant 0 : i32
    return %c0_i32, %c0_i32_0 : i32, i32
  }
  func.func @transform_7(%arg0: i32) -> (i32, i32) {
    %c0_i32 = arith.constant 0 : i32
    %c0_i32_0 = arith.constant 0 : i32
    %c0_i32_1 = arith.constant 0 : i32
    return %c0_i32, %c0_i32_0 : i32, i32
  }
}

</mosaic_0001>

<bundles_post_ra>
// kernel: gru_forward.1
= control target key start
LH: loop header
LB: loop body
LE: loop exit
PB: predicated region body
PF: predicated region fallthrough
CT: control target
= control target key end

     0   :  { %12 = vsyncpa [#allocation5], 0  ;;  %s1497_s24 = smov 0   ;;  %s1674_s0 = inlined_call_operand.vmem [shape: f32[8,2,96], index: 0, kind: input, shape index: {}]   ;;  %s1675_s1 = inlined_call_operand.vmem [shape: f32[32,96], index: 1, kind: input, shape index: {}]   ;;  %s1676_s2 = inlined_call_operand.vmem [shape: f32[1,96], index: 2, kind: input, shape index: {}]   ;;  %s1677_s3 = inlined_call_operand.vmem [shape: bf16[8,32,8], index: 3, kind: input, shape index: {}]   ;;  %s1678_s4 = inlined_call_operand.vmem [shape: f32[1,8], index: 4, kind: input, shape index: {}]   ;;  %s1679_s5 = inlined_call_operand.vmem [shape: f32[1,8], index: 5, kind: input, shape index: {}]   ;;  %s1680_s6 = inlined_call_operand.vmem [shape: f32[2,1], index: 6, kind: input, shape index: {}]   ;;  %s1681_s7 = inlined_call_operand.hbm [shape: f32[2,8], index: 7, kind: output, shape index: {}]  }
   0x1 LB: > { %s1503_s25 = sadd.s32 4294967295, %s1445_s24   ;;  %p1149_p0 = scmp.ge.s32.totalorder %s1445_s24, 1  ;;  %s1445_s24 = sphi %s1497_s24, %s18_s24  }
   0x2   : > { %p246_p1 = scmp.lt.s32.totalorder %s1445_s24, 3 }
   0x4   : > { %p247_p2 = pnand %p1149_p0, %p246_p1 }
   0x5   : > { %s1150_s26 = sshll.u32 (!%p247_p2), %s1503_s25, 2  ;;  %p1155_p4 = scmp.ne.s32.totalorder (!%p247_p2), %s1503_s25, 0 }
   0x6   : > { %250 = sbr.rel (%p247_p2) target bundleno = 3052 (0xbec), region = 48  ;;  %p280_p3 = scmp.lt.s32.totalorder (!%p247_p2), %s1150_s26, 7 }
   0xd   : > { %s1683_s26 = smov (!%p280_p3, %s1150_s26), 7  ;;  %296 = sbr.rel (%p1155_p4) target bundleno = 20 (0x14), region = 52 }
   0xe   : > { %s1151_s27 = sshll.u32 %s1683_s26, 1  ;;  %s1200_s28 = sshll.u32 %s1683_s26, 4  ;;  %vm297_vm0 = vcmask (!%p1155_p4), 254976   ;;  %vm299_vm1 = vcmask (!%p1155_p4), 58368   ;;  %v1447_v0 = vmov (!%p1155_p4), 0.0  }
   0xf   : > { %s1511_s8 = scalar_lea.vmem %s1674_s0, %s1151_s27  ;;  %s1516_s11 = scalar_lea.vmem %s1677_s3, %s1200_s28  ;;  %298 = vst.msk [vmem:[#allocation2] sm:$0x3] (!%p1155_p4), %vm297_vm0, %v1447_v0 }
  0x10   : > { %300 = vst.msk [vmem:[#allocation3] sm:$0x3] (!%p1155_p4), %vm299_vm1, %v1447_v0 }
  0x14 PF: > { %v301_v1 = vld [vmem:[%s1675_s1] sm:$0xff]  ;;  %v302_v2 = vld [vmem:[%s1675_s1 + $0x8] sm:$0xff]  ;;  %v303_v3 = vld [vmem:[%s1675_s1 + $0x10] sm:$0xff]  ;;  %v1448_v4 = vmov 0.0|0.0   ;;  %vm1449_vm2 = vmmov 0   ;;  %v1450_v7 = vmov 0.0  }
  0x15   : > { %1316 = vmatprep.subr.bf16.mxu0 %v1448_v4  ;;  %v1529_v5 = vpack.c.bf16 %v302_v2, %v301_v1  ;;  %v304_v6 = vld [vmem:[%s1675_s1 + $0x18] sm:$0xff]  ;;  %1243 = vmatprep.mubr.msk.f32.mxu0 %vm1449_vm2, %v1450_v7  ;;  %vm315_vm3 = vcmask 261120   ;;  %v1555_v10 = vld [vmem:[%s1676_s2] ss:$0 sm:$0xff]  ;;  %s1451_s22 = smov 64   ;;  %s1452_s23 = smov 96  }
  0x16   : > { %1246 = vmatprep.subr.bf16.mxu1 %v1450_v7  ;;  %1250 = vmatprep.mubr.msk.bf16.mxu1 %vm1449_vm2, %v1450_v7  ;;  %v1540_v8 = vpack.c.bf16 %v304_v6, %v303_v3  ;;  %v306_v9 = vld [vmem:[#allocation2] sm:$0x3]  ;;  %s1453_s26 = smov 32   ;;  %v1162_v35 = vld [vmem:[%s1511_s8 + $0x2] sm:$0x3]  ;;  %vm990_vm4 = vcmask 254976  }
  0x17   : > { %1318 = vmatpush3.bf16.msra.mxu0 %v1529_v5  ;;  %v308_v14 = vld [vmem:[%s1511_s8] sm:$0x3]  ;;  %v1172_v55 = vld [vmem:[%s1511_s8 + $0x4] sm:$0x3]  ;;  %vm992_vm5 = vcmask 58368   ;;  %p1192_p5 = scmp.ne.s32.totalorder %s1503_s25, 1 }
  0x18   : > { %1319 = vmatprep.subr.bf16.mxu0 %v1448_v4  ;;  %vm1004_vm6 = vcmask (!%p1192_p5), 1040384   ;;  %vm1000_vm7 = vcmask (!%p1192_p5), 7168   ;;  %vm1455_vm8 = vmmov (!%p1192_p5), 0  }
  0x1b   : > { %1321 = vmatpush3.bf16.msra.mxu0 %v1540_v8 }
  0x1c   : > { %1322 = vmatprep.subr.bf16.mxu0 %v1448_v4 }
  0x1e   : > { %1244 = vmatmul.mubr.msk.f32.vlgmr.msra.gmra.mrb[0].mxu0 %vm315_vm3, %v306_v9 }
  0x1f   : > { %1324 = vmatpush3.bf16.msra.mxu0 %v1529_v5  ;;  %1262 = vmatprep.mubr.msk.f32.mxu0 %vm1449_vm2, %v1450_v7 }
  0x20   : > { %1325 = vmatprep.subr.bf16.mxu0 %v1448_v4 }
  0x23   : > { %1327 = vmatpush3.bf16.msra.mxu0 %v1540_v8 }
  0x24   : > { %1328 = vmatprep.subr.bf16.mxu0 %v1448_v4 }
  0xf1   : > { %v385_v11 = vpop.f32.mrb[0].mxu0 }
  0xf2   : > { %v386_v12 = vadd.f32 %v1555_v10, %v385_v11  ;;  %v1245_v13 = vpop.f32.mrb[1].mxu0  ;;  %v1377_v11 = vld [vmem:[%s1516_s11] sm:$0xff]  }
  0xf3   : > { %1247 = vmatpush3.bf16.msra.mxu1 %v1377_v11 }
  0xf4   : > { %397 = vrot.lane.b32.xlu0 %v386_v12, %s1451_s22  ;;  %v389_v15 = vadd.f32 %v386_v12, %v308_v14  ;;  %1248 = vmatprep.subr.bf16.mxu1 %v1450_v7 }
  0xf6   : > { %v1158_v16 = vmul.f32 -1.442695, %v389_v15 }
  0xf8   : > { %1385 = vpow2.f32 %v1158_v16 }
 0x102   : > { %v1386_v17 = vpop.eup %1385 }
 0x103   : > { %v393_v18 = vadd.f32 1.0, %v1386_v17 }
 0x105   : > { %1387 = vrcp.f32 %v393_v18 }
 0x10f   : > { %v1388_v19 = vpop.eup %1387 }
 0x110   : > { %v407_v26 = vsub.f32 1.0, %v1388_v19 }
 0x166   : > { %v398_v20 = vpop.permute.xlu0 %397 }
 0x167   : > { %v400_v21 = vmul.f32 %v1388_v19, %v398_v20 }
 0x169   : > { %402 = vrot.lane.b32.xlu0 %v400_v21, %s1451_s22 }
 0x1db   : > { %v403_v22 = vpop.permute.xlu0 %402 }
 0x1dc   : > { %v405_v23 = vadd.f32 %v403_v22, %v308_v14  ;;  %v1182_v14 = vld [vmem:[%s1511_s8 + $0x6] sm:$0x3] }
 0x1de   : > { %1389 = vtanh.f32 %v405_v23 }
 0x1e8   : > { %v1390_v24 = vpop.eup %1389 }
 0x1e9   : > { %409 = vrot.lane.b32.xlu1 %v1390_v24, %s1452_s23 }
 0x1ed   : > { %413 = vrot.lane.b32.xlu1 %v306_v9, %s1453_s26 }
 0x25b   : > { %v410_v25 = vpop.permute.xlu1 %409 }
 0x25c   : > { %v412_v28 = vmul.f32 %v410_v25, %v407_v26  ;;  %v1379_v26 = vld [vmem:[%s1516_s11 + $0x10] sm:$0xff]  }
 0x25f   : > { %v414_v27 = vpop.permute.xlu1 %413 }
 0x260   : > { %v416_v29 = vmul.f32 %v1388_v19, %v414_v27  ;;  %v1378_v19 = vld [vmem:[%s1516_s11 + $0x8] sm:$0xff]  }
 0x261   : > { %1249 = vmatpush3.bf16.msra.mxu1 %v1378_v19 }
 0x262   : > { %v1562_v30 = vadd.f32 %v416_v29, %v412_v28  ;;  %1265 = vmatprep.subr.bf16.mxu1 %v1450_v7  ;;  %v1380_v28 = vld [vmem:[%s1516_s11 + $0x18] sm:$0xff]  }
 0x264   : > { %485 = vrot.lane.b32.xlu0 %v1562_v30, %s1452_s23  ;;  %v418_v22 = vpack.c.bf16 %v1562_v30, %v1562_v30 }
 0x2d6   : > { %v486_v31 = vpop.permute.xlu0 %485 }
 0x2d7   : > { %1263 = vmatmul.mubr.msk.f32.vlgmr.msra.gmra.mrb[2].mxu0 %vm315_vm3, %v486_v31 }
 0x2d8   : > { %1330 = vmatpush3.bf16.msra.mxu0 %v1529_v5  ;;  %1281 = vmatprep.mubr.msk.f32.mxu0 %vm1449_vm2, %v1450_v7 }
 0x2d9   : > { %1331 = vmatprep.subr.bf16.mxu0 %v1448_v4 }
 0x2dc   : > { %1333 = vmatpush3.bf16.msra.mxu0 %v1540_v8 }
 0x2dd   : > { %1334 = vmatprep.subr.bf16.mxu0 %v1448_v4 }
 0x3aa   : > { %v555_v32 = vpop.f32.mrb[2].mxu0 }
 0x3ab   : > { %v556_v33 = vadd.f32 %v1555_v10, %v555_v32  ;;  %v1264_v34 = vpop.f32.mrb[3].mxu0 }
 0x3ad   : > { %567 = vrot.lane.b32.xlu1 %v556_v33, %s1451_s22  ;;  %v559_v36 = vadd.f32 %v1162_v35, %v556_v33 }
 0x3af   : > { %v1164_v37 = vmul.f32 -1.442695, %v559_v36 }
 0x3b1   : > { %1391 = vpow2.f32 %v1164_v37 }
 0x3bb   : > { %v1392_v38 = vpop.eup %1391 }
 0x3bc   : > { %v563_v39 = vadd.f32 1.0, %v1392_v38 }
 0x3be   : > { %1393 = vrcp.f32 %v563_v39  ;;  %v1382_v39 = vld [vmem:[%s1516_s11 + $0x28] sm:$0xff]  }
 0x3c8   : > { %v1394_v40 = vpop.eup %1393 }
 0x3c9   : > { %v577_v46 = vsub.f32 1.0, %v1394_v40  ;;  %v583_v48 = vmul.f32 %v1394_v40, %v1562_v30 }
 0x41f   : > { %v568_v41 = vpop.permute.xlu1 %567 }
 0x420   : > { %v570_v42 = vmul.f32 %v1394_v40, %v568_v41  ;;  %v1383_v40 = vld [vmem:[%s1516_s11 + $0x30] sm:$0xff]  }
 0x422   : > { %572 = vrot.lane.b32.xlu0 %v570_v42, %s1451_s22  ;;  %v1384_v42 = vld [vmem:[%s1516_s11 + $0x38] sm:$0xff]  }
 0x494   : > { %v573_v43 = vpop.permute.xlu0 %572 }
 0x495   : > { %v575_v44 = vadd.f32 %v1162_v35, %v573_v43  ;;  %v1381_v35 = vld [vmem:[%s1516_s11 + $0x20] sm:$0xff]  }
 0x497   : > { %1395 = vtanh.f32 %v575_v44 }
 0x4a1   : > { %v1396_v45 = vpop.eup %1395 }
 0x4a2   : > { %579 = vrot.lane.b32.xlu1 %v1396_v45, %s1452_s23  ;;  %v307_v45 = vld [vmem:[#allocation3] sm:$0x3] }
 0x514   : > { %v580_v47 = vpop.permute.xlu1 %579 }
 0x515   : > { %v582_v49 = vmul.f32 %v580_v47, %v577_v46 }
 0x517   : > { %v1579_v50 = vadd.f32 %v583_v48, %v582_v49 }
 0x519   : > { %653 = vrot.lane.b32.xlu0 %v1579_v50, %s1452_s23  ;;  %v585_v30 = vpack.c.bf16 %v1579_v50, %v1579_v50 }
 0x58b   : > { %v654_v51 = vpop.permute.xlu0 %653 }
 0x58c   : > { %1282 = vmatmul.mubr.msk.f32.vlgmr.msra.gmra.mrb[4].mxu0 %vm315_vm3, %v654_v51  ;;  %v1454_v51 = vmov (!%p1192_p5), 0.0  }
 0x58d   : > { %1336 = vmatpush3.bf16.msra.mxu0 %v1529_v5  ;;  %1300 = vmatprep.mubr.msk.f32.mxu0 %vm1449_vm2, %v1450_v7 }
 0x58e   : > { %1337 = vmatprep.subr.bf16.mxu0 %v1448_v4 }
 0x591   : > { %1339 = vmatpush3.bf16.msra.mxu0 %v1540_v8 }
 0x592   : > { %1311 = vmatprep.subr.mxu0 (!%p1192_p5), %v1454_v51 }
 0x65f   : > { %v723_v52 = vpop.f32.mrb[4].mxu0 }
 0x660   : > { %v724_v53 = vadd.f32 %v1555_v10, %v723_v52  ;;  %v1283_v54 = vpop.f32.mrb[5].mxu0  ;;  %v998_v52 = vld [vmem:[%s1680_s6] sm:$0x3] (!%p1192_p5) }
 0x661   : > { %v1195_v54 = vld [vmem:[%s1679_s5] ss:$0 sm:$0xff] (!%p1192_p5) }
 0x662   : > { %735 = vrot.lane.b32.xlu1 %v724_v53, %s1451_s22  ;;  %v727_v56 = vadd.f32 %v1172_v55, %v724_v53 }
 0x664   : > { %v1174_v57 = vmul.f32 -1.442695, %v727_v56 }
 0x666   : > { %1397 = vpow2.f32 %v1174_v57 }
 0x670   : > { %v1398_v58 = vpop.eup %1397 }
 0x671   : > { %v731_v59 = vadd.f32 1.0, %v1398_v58 }
 0x673   : > { %1399 = vrcp.f32 %v731_v59 }
 0x67d   : > { %v1400_v60 = vpop.eup %1399 }
 0x67e   : > { %v745_v2 = vsub.f32 1.0, %v1400_v60  ;;  %v751_v4 = vmul.f32 %v1400_v60, %v1579_v50 }
 0x6d4   : > { %v736_v61 = vpop.permute.xlu1 %735 }
 0x6d5   : > { %v738_v62 = vmul.f32 %v1400_v60, %v736_v61 }
 0x6d7   : > { %740 = vrot.lane.b32.xlu0 %v738_v62, %s1451_s22 }
 0x749   : > { %v741_v63 = vpop.permute.xlu0 %740 }
 0x74a   : > { %v743_v0 = vadd.f32 %v1172_v55, %v741_v63 }
 0x74c   : > { %1401 = vtanh.f32 %v743_v0 }
 0x756   : > { %v1402_v1 = vpop.eup %1401 }
 0x757   : > { %747 = vrot.lane.b32.xlu1 %v1402_v1, %s1452_s23 }
 0x7c9   : > { %v748_v3 = vpop.permute.xlu1 %747 }
 0x7ca   : > { %v750_v5 = vmul.f32 %v748_v3, %v745_v2 }
 0x7cc   : > { %v752_v6 = vadd.f32 %v751_v4, %v750_v5 }
 0x7ce   : > { %821 = vrot.lane.b32.xlu0 %v752_v6, %s1452_s23  ;;  %v753_v23 = vpack.c.bf16 %v752_v6, %v752_v6 }
 0x840   : > { %v822_v8 = vpop.permute.xlu0 %821 }
 0x841   : > { %1301 = vmatmul.mubr.msk.f32.vlgmr.msra.gmra.mrb[6].mxu0 %vm315_vm3, %v822_v8 }
 0x842   : > { %1313 = vmatprep.mubr.msk.f32.mxu0 (!%p1192_p5), %vm1455_vm8, %v1454_v51 }
 0x914   : > { %v891_v9 = vpop.f32.mrb[6].mxu0 }
 0x915   : > { %v892_v12 = vadd.f32 %v1555_v10, %v891_v9  ;;  %v1302_v13 = vpop.f32.mrb[7].mxu0 }
 0x917   : > { %903 = vrot.lane.b32.xlu1 %v892_v12, %s1451_s22  ;;  %v895_v15 = vadd.f32 %v1182_v14, %v892_v12 }
 0x919   : > { %v1184_v16 = vmul.f32 -1.442695, %v895_v15 }
 0x91b   : > { %1403 = vpow2.f32 %v1184_v16 }
 0x925   : > { %v1404_v17 = vpop.eup %1403 }
 0x926   : > { %v899_v18 = vadd.f32 1.0, %v1404_v17 }
 0x928   : > { %1405 = vrcp.f32 %v899_v18 }
 0x932   : > { %v1406_v10 = vpop.eup %1405 }
 0x933   : > { %v913_v31 = vsub.f32 1.0, %v1406_v10  ;;  %v919_v33 = vmul.f32 %v1406_v10, %v752_v6 }
 0x989   : > { %v904_v20 = vpop.permute.xlu1 %903 }
 0x98a   : > { %v906_v21 = vmul.f32 %v1406_v10, %v904_v20 }
 0x98c   : > { %908 = vrot.lane.b32.xlu0 %v906_v21, %s1451_s22 }
 0x990   : > { %424 = vrot.lane.b32.xlu0 %v418_v22, %s1452_s23 }
 0x994   : > { %760 = vrot.lane.b32.xlu0 %v753_v23, %s1452_s23 }
 0x9fe   : > { %v909_v24 = vpop.permute.xlu0 %908 }
 0x9ff   : > { %v911_v25 = vadd.f32 %v1182_v14, %v909_v24 }
 0xa01   : > { %1407 = vtanh.f32 %v911_v25 }
 0xa02   : > { %v425_v27 = vpop.permute.xlu0 %424 }
 0xa03   : > { %1251 = vmatmul.mubr.msk.bf16.vlgmr.msra.gmra.mrb[0].mxu1 %vm315_vm3, %v425_v27 }
 0xa04   : > { %1266 = vmatpush3.bf16.msra.mxu1 %v1379_v26  ;;  %1269 = vmatprep.mubr.msk.bf16.mxu1 %vm1449_vm2, %v1450_v7 }
 0xa05   : > { %1267 = vmatprep.subr.bf16.mxu1 %v1450_v7 }
 0xa06   : > { %v761_v41 = vpop.permute.xlu0 %760 }
 0xa08   : > { %1268 = vmatpush3.bf16.msra.mxu1 %v1380_v28 }
 0xa09   : > { %1284 = vmatprep.subr.bf16.mxu1 %v1450_v7 }
 0xa0b   : > { %v1408_v29 = vpop.eup %1407 }
 0xa0c   : > { %915 = vrot.lane.b32.xlu1 %v1408_v29, %s1452_s23 }
 0xa10   : > { %592 = vrot.lane.b32.xlu1 %v585_v30, %s1452_s23 }
 0xa7e   : > { %v916_v32 = vpop.permute.xlu1 %915 }
 0xa7f   : > { %v918_v34 = vmul.f32 %v916_v32, %v913_v31 }
 0xa81   : > { %v920_v36 = vadd.f32 %v919_v33, %v918_v34 }
 0xa82   : > { %v593_v37 = vpop.permute.xlu1 %592 }
 0xa83   : > { %987 = vrot.lane.b32.xlu0 %v920_v36, %s1452_s23  ;;  %1270 = vmatmul.mubr.msk.bf16.vlgmr.msra.gmra.mrb[0].mxu1 %vm315_vm3, %v593_v37  ;;  %v921_v38 = vpack.c.bf16 %v920_v36, %v920_v36 }
 0xa84   : > { %1285 = vmatpush3.bf16.msra.mxu1 %v1381_v35  ;;  %1288 = vmatprep.mubr.msk.bf16.mxu1 %vm1449_vm2, %v1450_v7 }
 0xa85   : > { %928 = vrot.lane.b32.xlu1 %v921_v38, %s1452_s23  ;;  %1286 = vmatprep.subr.bf16.mxu1 %v1450_v7 }
 0xa88   : > { %1287 = vmatpush3.bf16.msra.mxu1 %v1382_v39 }
 0xa89   : > { %1303 = vmatprep.subr.bf16.mxu1 %v1450_v7 }
 0xa8f   : > { %1289 = vmatmul.mubr.msk.bf16.vlgmr.msra.gmra.mrb[0].mxu1 %vm315_vm3, %v761_v41 }
 0xa90   : > { %1304 = vmatpush3.bf16.msra.mxu1 %v1383_v40  ;;  %1307 = vmatprep.mubr.msk.bf16.mxu1 %vm1449_vm2, %v1450_v7 }
 0xa91   : > { %1305 = vmatprep.subr.bf16.mxu1 %v1450_v7  ;;  %v999_v7 = vld [vmem:[%s1678_s4] sm:$0x1] (!%p1192_p5) }
 0xa92   : > { %1312 = vmatpush3.msk.msra.mxu0 (!%p1192_p5), %vm1004_vm6, %v999_v7 }
 0xa93   : > { %1314 = vmatmul.mubr.msk.f32.vlgmr.msra.gmra.mrb[0].mxu0 (!%p1192_p5), %vm1000_vm7, %v998_v52 }
 0xa94   : > { %1306 = vmatpush3.bf16.msra.mxu1 %v1384_v42 }
 0xaf5   : > { %v988_v43 = vpop.permute.xlu0 %987 }
 0xaf6   : > { %991 = vst.msk [vmem:[#allocation2] sm:$0x3] %vm990_vm4, %v988_v43 }
 0xaf7   : > { %v929_v44 = vpop.permute.xlu1 %928 }
 0xaf8   : > { %1308 = vmatmul.mubr.msk.bf16.vlgmr.msra.gmra.mrb[0].mxu1 %vm315_vm3, %v929_v44 }
 0xb66   : > { %v1074_v53 = vpop.f32.mrb[0].mxu0 (!%p1192_p5) }
 0xb67   : > { %v1315_v56 = vpop.f32.mrb[1].mxu0 (!%p1192_p5) }
 0xbc8   : > { %997 = sbr.rel (%p1192_p5) target bundleno = 3027 (0xbd3), region = 56 }
 0xbcb   : > { %v979_v46 = vpop.f32.mrb[0].mxu1 }
 0xbcc   : > { %v1340_v47 = vadd.f32 %v979_v46, %v307_v45  ;;  %v1309_v48 = vpop.f32.mrb[1].mxu1 }
 0xbcd   : > { %v982_v49 = vpop.f32.mrb[2].mxu1 }
 0xbce   : > { %993 = vst.msk [vmem:[#allocation3] sm:$0x3] %vm992_vm5, %v1340_v47  ;;  %v1310_v50 = vpop.f32.mrb[3].mxu1  ;;  %v1078_v55 = vadd.f32 (!%p1192_p5), %v1340_v47, %v1074_v53 }
 0xbd0   : > { %v1086_v57 = vadd.f32 %v1195_v54, %v1078_v55 }
 0xbd2   : > { %1087 = vst.msk [vmem:[#allocation4] sm:$0x3] %vm992_vm5, %v1086_v57 }
 0xbd3 PF: > { %p1357_p6 = scmp.eq.s32.totalorder %s1503_s25, 1  ;;  %s1456_s10 = smov [#allocation4]  }
 0xbd4   : > { %s1095_s11 = sshll.u32 %s1456_s10, 4  ;;  %s1096_s11 = int_to_ptr.vmem [resolvable:$true] %s1095_s11 }
 0xbd5   : > { %s1409_s12 = scalar_lea.vmem %s1096_s11, 32  ;;  %p1416_p10 = scmp.lt.s32.totalorder %s1096_s11, %s1096_s11 }
 0xbd6   : > { %p1410_p7 = scmp.ne.s32.totalorder %s1096_s11, %s1409_s12  ;;  %p1417_p11 = scmp.lt.s32.totalorder %s1409_s12, %s1409_s12 }
 0xbd8   : > { %p1411_p8 = pnand %p1410_p7, %p1357_p6  ;;  %p1418_p12 = por %p1417_p11, %p1416_p10 }
 0xbda   : > { %p1412_p9 = pneg %p1411_p8 }
 0xbdc   : > { %p1419_p13 = pnand %p1418_p12, %p1412_p9 }
 0xbde   : > { %1422 = shalt.err (!%p1419_p13)
}
 0xbdf   : > { %s1423_s15 = scalar_lea.hbm %s1681_s7, 32 }
 0xbe0   : > { %p1424_p0 = scmp.ne.s32.totalorder %s1681_s7, %s1423_s15  ;;  %p1429_p3 = scmp.lt.u32.totalorder %s1423_s15, %s1681_s7 }
 0xbe2   : > { %p1425_p1 = pnand %p1424_p0, %p1357_p6 }
 0xbe4   : > { %p1426_p2 = pneg %p1425_p1 }
 0xbe6   : > { %p1431_p4 = pnand %p1429_p3, %p1426_p2 }
 0xbe8   : > { %1434 = shalt.err (!%p1431_p4)
}
 0xbe9   : > { %1354 = dma.vmem_to_hbm [thread:$0]  (%p1357_p6), %s1096_s11, 32, %s1681_s7, [#allocation5]  }
 0xbea   : > { %1440 = dma.done.wait (%p1357_p6), [#allocation5], 32  }
 0xbeb   : > { %1442 = vsyncadd (%p1357_p6), [#allocation5], 4294967264 }
 0xbec PF: > { %s18_s24 = sadd.s32 1, %s1445_s24  }
 0xbed   : > { %p15_p5 = scmp.ge.s32.totalorder %s18_s24, 4  }
 0xbef   :  { %17 = sbr.rel (!%p15_p5) target bundleno = 1 (0x1), region = 92 }
 0xbf6   :  { %1108 = vsyncpa [#allocation5], 1 }
 0xbf7   :  { %1110 = vsyncpa [#allocation5 + $0x1], 1 }

</bundles_post_ra>
